<compile_context>
chip_gen: v7x
topology: tpu7x:2x2x1
jax: 0.10.0
libtpu: 0.0.40
codegen_flags: <defaults>
</compile_context>

<pallas_src>
import numpy as np
import jax
import jax.numpy as jnp
from jax.experimental import pallas as pl
from jax.experimental.pallas import tpu as pltpu


def _hbm_copy_kernel(x_hbm, o_hbm, sem):
    # Single HBM->HBM DMA of the whole tensor.  No VMEM staging, no vld/vst
    # slots, no TC compute — the DMA engine does everything.
    cp = pltpu.make_async_copy(x_hbm, o_hbm, sem)
    cp.start()
    cp.wait()


def pallas_reshape(x, size, *, use_kernel=True):
    """Equivalent of Reshape(*size)(x) == x.view(len(x), *size)."""
    n = x.shape[0]
    flat = int(np.prod(x.shape[1:]))
    target_flat = int(np.prod(size))
    if flat != target_flat:
        raise ValueError(f"cannot reshape per-batch {flat} elems into {size}")

    if not use_kernel:
        # Production path recommended by the review: a reshape is pure
        # metadata in XLA — zero HBM traffic.
        return x.reshape(n, *size)

    # Kernel path: one HBM->HBM DMA copy (identity on the contiguous buffer),
    # then the zero-cost metadata regrouping in the wrapper.
    out = pl.pallas_call(
        _hbm_copy_kernel,
        out_shape=jax.ShapeDtypeStruct(x.shape, x.dtype),
        in_specs=[pl.BlockSpec(memory_space=pl.ANY)],
        out_specs=pl.BlockSpec(memory_space=pl.ANY),
        scratch_shapes=[pltpu.SemaphoreType.DMA(())],
    )(x)

    return out.reshape(n, *size)


if __name__ == "__main__":
    key = jax.random.PRNGKey(0)
    # Small NCHW input, consistent with a conv-style feature map.
    N, C, H, W = 2, 4, 16, 16
    x = jax.random.normal(key, (N, C, H, W), dtype=jnp.float32)

    # Reshape(*size) with size = (16, 64): (2, 4, 16, 16) -> (2, 16, 64)
    size = (16, 64)

    # Run the Pallas kernel path once.
    out = pallas_reshape(x, size, use_kernel=True)
    out = jax.block_until_ready(out)

    # Reference: plain JAX reshape (same semantics as torch .view on a
    # contiguous tensor).
    ref = x.reshape(N, *size)

    assert out.shape == (N, *size), out.shape
    assert out.dtype == x.dtype
    np.testing.assert_array_equal(np.asarray(out), np.asarray(ref))

    # Also sanity-check the zero-copy production path.
    out_meta = jax.block_until_ready(pallas_reshape(x, size, use_kernel=False))
    np.testing.assert_array_equal(np.asarray(out_meta), np.asarray(ref))

    print("KERNEL_OK")
</pallas_src>

<mosaic_0001>
module attributes {stable_mosaic.version = 11 : i64} {
  func.func @_hbm_copy_kernel(%arg0: memref<2x4x16x16xf32, #tpu.memory_space<any>>, %arg1: memref<2x4x16x16xf32, #tpu.memory_space<any>>, %arg2: memref<!tpu.dma_semaphore, #tpu.memory_space<semaphore_mem>>) attributes {dimension_semantics = [], scalar_prefetch = 0 : i64, scratch_operands = 1 : i64, tpu.core_type = #tpu.core_type<tc>} {
    tpu.enqueue_dma source(%arg0 : memref<2x4x16x16xf32, #tpu.memory_space<any>>) target(%arg1 : memref<2x4x16x16xf32, #tpu.memory_space<any>>) target_semaphore(%arg2 : memref<!tpu.dma_semaphore, #tpu.memory_space<semaphore_mem>>)
    tpu.wait_dma2 semaphore(%arg2 : memref<!tpu.dma_semaphore, #tpu.memory_space<semaphore_mem>>) src(%arg0 : memref<2x4x16x16xf32, #tpu.memory_space<any>>) dst(%arg1 : memref<2x4x16x16xf32, #tpu.memory_space<any>>)
    return
  }
}

</mosaic_0001>

<bundles_post_ra>
// kernel: tpu_custom_call.1
= control target key start
LH: loop header
LB: loop body
LE: loop exit
PB: predicated region body
PF: predicated region fallthrough
CT: control target
= control target key end

     0   :  { %s36_s6 = smov [#allocation2]   ;;  %s37_s7 = smov [#allocation3]   ;;  %s55_s0 = inlined_call_operand.hbm [shape: f32[2,4,16,16], index: 0, kind: input, shape index: {}]   ;;  %s56_s1 = inlined_call_operand.hbm [shape: f32[2,4,16,16], index: 1, kind: output, shape index: {}]  }
   0x1   :  { %s38_s8 = smov 0  }
   0x2   :  { %18 = dma.general %s55_s0, 2048, %s56_s1, %s36_s6, %s37_s7, [#allocation4], %s38_s8, 0  }
   0x3   :  { %34 = dma.done.wait [#allocation2], 2048 }
   0x4   :  { %35 = vsyncadd [#allocation2], 4294965248 }
   0x5   :  { %24 = vsyncmov [#allocation2] }
   0x8   :  { %s25_s13 = vpop.sfrf %24 }
   0x9   :  { %p30_p0 = scmp.ne.s32.totalorder %s25_s13, 0 }
   0xb   :  { %29 = shalt.err (%p30_p0)  }

</bundles_post_ra>
